<compile_context>
chip_gen: v7x
topology: tpu7x:2x2x1
jax: 0.10.0
libtpu: 0.0.40
codegen_flags: <defaults>
</compile_context>

<pallas_src>
import functools

import jax
import jax.numpy as jnp
from jax.experimental import pallas as pl
from jax.experimental.pallas import tpu as pltpu


def _fcn_kernel(*refs, n_hidden_layers: int, n_input: int):
    """One batch tile of the whole MLP.  Activations are (features, TB)."""
    if n_hidden_layers > 0:
        (x_ref, w_in_ref, b_in_ref, w_h_ref, b_h_ref,
         w_out_ref, b_out_ref, o_ref) = refs
    else:
        # n_layers == 1: zero-sized hidden stacks are never passed to Mosaic.
        x_ref, w_in_ref, b_in_ref, w_out_ref, b_out_ref, o_ref = refs
        w_h_ref = b_h_ref = None

    x = x_ref[...]          # (N_INPUT, TB)  -- batch on lanes
    w_in = w_in_ref[...]    # (H, N_INPUT)

    # ---- Input layer: Linear + Tanh -------------------------------------
    if n_input <= 8:
        # Small-K contraction as VPU broadcast FMAs: (H,1)*(1,TB) -> (H,TB).
        acc = w_in[:, 0:1] * x[0:1, :] + b_in_ref[...]
        for k in range(1, n_input):
            acc = acc + w_in[:, k:k + 1] * x[k:k + 1, :]
    else:
        acc = (jnp.dot(w_in, x, preferred_element_type=jnp.float32)
               + b_in_ref[...])
    h = jnp.tanh(acc)                                   # (H, TB)

    # ---- Hidden layers: (N_LAYERS-1) x [Linear + Tanh], unrolled ---------
    for l in range(n_hidden_layers):
        h = jnp.tanh(
            jnp.dot(w_h_ref[l], h, preferred_element_type=jnp.float32)
            + b_h_ref[l]
        )

    # ---- Output layer: Linear (no activation), lane-dense store ----------
    out = (jnp.dot(w_out_ref[...], h, preferred_element_type=jnp.float32)
           + b_out_ref[...])                            # (O, TB)
    o_ref[...] = out.astype(o_ref.dtype)


def fcn_forward(x, params, *, tile_b: int = 512):
    """Forward pass.

    x: (B, N_INPUT).
    params (PyTorch-native layout):
      w_in  (H, I),   b_in  (H, 1)
      w_h   (L-1, H, H), b_h (L-1, H, 1)
      w_out (O, H),   b_out (O, 1)
    Returns (B, O).

    tile_b: batch tile (lanes). Size per generation: ~2k-8k on v7x (64 MiB
    VMEM), up to ~16k-32k on v5e/v6e; default 512 is safe everywhere.
    """
    w_in, b_in = params["w_in"], params["b_in"]
    w_h, b_h = params["w_h"], params["b_h"]
    w_out, b_out = params["w_out"], params["b_out"]

    B, n_input = x.shape
    n_hidden = w_in.shape[0]
    n_out = w_out.shape[0]
    n_hidden_layers = w_h.shape[0]

    # Batch tile: multiple of 128 (lane width); don't over-pad tiny batches.
    round_b = pl.cdiv(B, 128) * 128
    tb = max(128, (min(tile_b, round_b) // 128) * 128)
    b_pad = pl.cdiv(B, tb) * tb
    grid = (b_pad // tb,)

    # Transpose so batch is the lane axis; zero-pad batch to the tile grid.
    x_t = x.T                                           # (N_INPUT, B)
    if b_pad != B:
        x_t = jnp.pad(x_t, ((0, 0), (0, b_pad - B)))

    kernel = functools.partial(
        _fcn_kernel, n_hidden_layers=n_hidden_layers, n_input=n_input)

    def resident(*shape):
        # Weights/biases: full block, constant index_map -> stay in VMEM.
        return pl.BlockSpec(shape, lambda i: (0,) * len(shape))

    in_specs = [
        pl.BlockSpec((n_input, tb), lambda i: (0, i)),  # x tile
        resident(n_hidden, n_input),                    # w_in
        resident(n_hidden, 1),                          # b_in
    ]
    args = [x_t, w_in, b_in]
    if n_hidden_layers > 0:
        in_specs += [
            resident(n_hidden_layers, n_hidden, n_hidden),  # w_h
            resident(n_hidden_layers, n_hidden, 1),         # b_h
        ]
        args += [w_h, b_h]
    in_specs += [resident(n_out, n_hidden), resident(n_out, 1)]
    args += [w_out, b_out]

    out_t = pl.pallas_call(
        kernel,
        out_shape=jax.ShapeDtypeStruct((n_out, b_pad), x.dtype),
        grid=grid,
        in_specs=in_specs,
        out_specs=pl.BlockSpec((n_out, tb), lambda i: (0, i)),
        compiler_params=pltpu.CompilerParams(
            dimension_semantics=("parallel",)),
    )(*args)

    return out_t[:, :B].T                               # (B, O)


def init_fcn_params(key, n_input, n_output, n_hidden, n_layers,
                    dtype=jnp.float32):
    """PyTorch-default-style init, kept in native (out, in) weight layout."""
    def linear(k, fan_in, fan_out):
        kw, kb = jax.random.split(k)
        bound = 1.0 / jnp.sqrt(jnp.asarray(fan_in, jnp.float32))
        w = jax.random.uniform(kw, (fan_out, fan_in), dtype, -bound, bound)
        b = jax.random.uniform(kb, (fan_out, 1), dtype, -bound, bound)
        return w, b

    keys = jax.random.split(key, n_layers + 1)
    w_in, b_in = linear(keys[0], n_input, n_hidden)

    w_hs, b_hs = [], []
    for i in range(n_layers - 1):
        w, b = linear(keys[1 + i], n_hidden, n_hidden)
        w_hs.append(w)
        b_hs.append(b)
    if n_layers - 1 > 0:
        w_h = jnp.stack(w_hs, axis=0)          # (L-1, H, H)
        b_h = jnp.stack(b_hs, axis=0)          # (L-1, H, 1)
    else:
        w_h = jnp.zeros((0, n_hidden, n_hidden), dtype)
        b_h = jnp.zeros((0, n_hidden, 1), dtype)

    w_out, b_out = linear(keys[n_layers], n_hidden, n_output)
    return {"w_in": w_in, "b_in": b_in, "w_h": w_h, "b_h": b_h,
            "w_out": w_out, "b_out": b_out}


def fcn_ref(x, params):
    """Pure-JAX reference (mirrors the PyTorch forward)."""
    h = jnp.tanh(x @ params["w_in"].T + params["b_in"].T)
    for l in range(params["w_h"].shape[0]):
        h = jnp.tanh(h @ params["w_h"][l].T + params["b_h"][l].T)
    return h @ params["w_out"].T + params["b_out"].T


if __name__ == "__main__":
    key = jax.random.PRNGKey(0)

    # Test 1: small PINN-like config, FCN(2, 1, 32, 3), batch 16 (padded tile).
    N_INPUT, N_OUTPUT, N_HIDDEN, N_LAYERS = 2, 1, 32, 3
    BATCH = 16
    k_x, k_p, k_x2, k_p2 = jax.random.split(key, 4)
    x = jax.random.normal(k_x, (BATCH, N_INPUT), dtype=jnp.float32)
    params = init_fcn_params(k_p, N_INPUT, N_OUTPUT, N_HIDDEN, N_LAYERS)

    out = jax.block_until_ready(fcn_forward(x, params))
    ref = fcn_ref(x, params)
    assert out.shape == (BATCH, N_OUTPUT), out.shape
    assert jnp.allclose(out, ref, atol=1e-5, rtol=1e-5), (
        float(jnp.max(jnp.abs(out - ref))))

    # Test 2: multiple grid steps + ragged final tile + n_layers == 1 edge case.
    x2 = jax.random.normal(k_x2, (300, N_INPUT), dtype=jnp.float32)
    params2 = init_fcn_params(k_p2, N_INPUT, N_OUTPUT, N_HIDDEN, n_layers=1)
    out2 = jax.block_until_ready(fcn_forward(x2, params2, tile_b=128))
    ref2 = fcn_ref(x2, params2)
    assert out2.shape == (300, N_OUTPUT), out2.shape
    assert jnp.allclose(out2, ref2, atol=1e-5, rtol=1e-5), (
        float(jnp.max(jnp.abs(out2 - ref2))))

    print("KERNEL_OK")
</pallas_src>

<mosaic_0001>
module attributes {stable_mosaic.version = 11 : i64} {
  func.func @_fcn_kernel(%arg0: i32, %arg1: memref<2x128xf32, #tpu.memory_space<vmem>>, %arg2: memref<32x2xf32, #tpu.memory_space<vmem>>, %arg3: memref<32x1xf32, #tpu.memory_space<vmem>>, %arg4: memref<2x32x32xf32, #tpu.memory_space<vmem>>, %arg5: memref<2x32x1xf32, #tpu.memory_space<vmem>>, %arg6: memref<1x32xf32, #tpu.memory_space<vmem>>, %arg7: memref<1x1xf32, #tpu.memory_space<vmem>>, %arg8: memref<1x128xf32, #tpu.memory_space<vmem>>) attributes {dimension_semantics = [#tpu.dimension_semantics<parallel>], iteration_bounds = array<i64: 1>, scalar_prefetch = 0 : i64, scratch_operands = 0 : i64, tpu.core_type = #tpu.core_type<tc>, window_params = [{transform_indices = @transform_0, window_bounds = array<i64: 2, 128>}, {pipeline_mode = #tpu.pipeline_mode<synchronous>, transform_indices = @transform_1, window_bounds = array<i64: 32, 2>}, {pipeline_mode = #tpu.pipeline_mode<synchronous>, transform_indices = @transform_2, window_bounds = array<i64: 32, 1>}, {pipeline_mode = #tpu.pipeline_mode<synchronous>, transform_indices = @transform_3, window_bounds = array<i64: 2, 32, 32>}, {pipeline_mode = #tpu.pipeline_mode<synchronous>, transform_indices = @transform_4, window_bounds = array<i64: 2, 32, 1>}, {pipeline_mode = #tpu.pipeline_mode<synchronous>, transform_indices = @transform_5, window_bounds = array<i64: 1, 32>}, {pipeline_mode = #tpu.pipeline_mode<synchronous>, transform_indices = @transform_6, window_bounds = array<i64: 1, 1>}, {transform_indices = @transform_7, window_bounds = array<i64: 1, 128>}]} {
    %c0 = arith.constant 0 : index
    %c0_0 = arith.constant 0 : index
    %0 = vector.load %arg1[%c0, %c0_0] : memref<2x128xf32, #tpu.memory_space<vmem>>, vector<2x128xf32>
    %c0_1 = arith.constant 0 : index
    %c0_2 = arith.constant 0 : index
    %1 = vector.load %arg2[%c0_1, %c0_2] : memref<32x2xf32, #tpu.memory_space<vmem>>, vector<32x2xf32>
    %2 = vector.extract_strided_slice %1 {offsets = [0, 0], sizes = [32, 1], strides = [1, 1]} : vector<32x2xf32> to vector<32x1xf32>
    %3 = vector.extract_strided_slice %0 {offsets = [0, 0], sizes = [1, 128], strides = [1, 1]} : vector<2x128xf32> to vector<1x128xf32>
    %4 = vector.broadcast %2 : vector<32x1xf32> to vector<32x128xf32>
    %5 = vector.broadcast %3 : vector<1x128xf32> to vector<32x128xf32>
    %6 = arith.mulf %4, %5 : vector<32x128xf32>
    %c0_3 = arith.constant 0 : index
    %c0_4 = arith.constant 0 : index
    %7 = vector.load %arg3[%c0_3, %c0_4] : memref<32x1xf32, #tpu.memory_space<vmem>>, vector<32x1xf32>
    %8 = vector.broadcast %7 : vector<32x1xf32> to vector<32x128xf32>
    %9 = arith.addf %6, %8 : vector<32x128xf32>
    %10 = vector.extract_strided_slice %1 {offsets = [0, 1], sizes = [32, 1], strides = [1, 1]} : vector<32x2xf32> to vector<32x1xf32>
    %11 = vector.extract_strided_slice %0 {offsets = [1, 0], sizes = [1, 128], strides = [1, 1]} : vector<2x128xf32> to vector<1x128xf32>
    %12 = vector.broadcast %10 : vector<32x1xf32> to vector<32x128xf32>
    %13 = vector.broadcast %11 : vector<1x128xf32> to vector<32x128xf32>
    %14 = arith.mulf %12, %13 : vector<32x128xf32>
    %15 = arith.addf %9, %14 : vector<32x128xf32>
    %16 = math.tanh %15 : vector<32x128xf32>
    %c0_5 = arith.constant 0 : index
    %c0_6 = arith.constant 0 : index
    %c0_7 = arith.constant 0 : index
    %17 = vector.load %arg4[%c0_5, %c0_6, %c0_7] : memref<2x32x32xf32, #tpu.memory_space<vmem>>, vector<1x32x32xf32>
    %18 = vector.shape_cast %17 : vector<1x32x32xf32> to vector<32x32xf32>
    %cst = arith.constant dense<0.000000e+00> : vector<32x128xf32>
    %19 = tpu.matmul %18, %16, %cst {dimension_numbers = #tpu.dot_dimension_numbers<[1], [0], [0], [1], [0, 0, 1, 1], [], []>} : vector<32x32xf32>, vector<32x128xf32>, vector<32x128xf32> -> vector<32x128xf32>
    %c0_8 = arith.constant 0 : index
    %c0_9 = arith.constant 0 : index
    %c0_10 = arith.constant 0 : index
    %20 = vector.load %arg5[%c0_8, %c0_9, %c0_10] : memref<2x32x1xf32, #tpu.memory_space<vmem>>, vector<1x32x1xf32>
    %21 = vector.shape_cast %20 : vector<1x32x1xf32> to vector<32x1xf32>
    %22 = vector.broadcast %21 : vector<32x1xf32> to vector<32x128xf32>
    %23 = arith.addf %19, %22 : vector<32x128xf32>
    %24 = math.tanh %23 : vector<32x128xf32>
    %c1 = arith.constant 1 : index
    %c0_11 = arith.constant 0 : index
    %c0_12 = arith.constant 0 : index
    %25 = vector.load %arg4[%c1, %c0_11, %c0_12] : memref<2x32x32xf32, #tpu.memory_space<vmem>>, vector<1x32x32xf32>
    %26 = vector.shape_cast %25 : vector<1x32x32xf32> to vector<32x32xf32>
    %cst_13 = arith.constant dense<0.000000e+00> : vector<32x128xf32>
    %27 = tpu.matmul %26, %24, %cst_13 {dimension_numbers = #tpu.dot_dimension_numbers<[1], [0], [0], [1], [0, 0, 1, 1], [], []>} : vector<32x32xf32>, vector<32x128xf32>, vector<32x128xf32> -> vector<32x128xf32>
    %c1_14 = arith.constant 1 : index
    %c0_15 = arith.constant 0 : index
    %c0_16 = arith.constant 0 : index
    %28 = vector.load %arg5[%c1_14, %c0_15, %c0_16] : memref<2x32x1xf32, #tpu.memory_space<vmem>>, vector<1x32x1xf32>
    %29 = vector.shape_cast %28 : vector<1x32x1xf32> to vector<32x1xf32>
    %30 = vector.broadcast %29 : vector<32x1xf32> to vector<32x128xf32>
    %31 = arith.addf %27, %30 : vector<32x128xf32>
    %32 = math.tanh %31 : vector<32x128xf32>
    %c0_17 = arith.constant 0 : index
    %c0_18 = arith.constant 0 : index
    %33 = vector.load %arg6[%c0_17, %c0_18] : memref<1x32xf32, #tpu.memory_space<vmem>>, vector<1x32xf32>
    %cst_19 = arith.constant dense<0.000000e+00> : vector<1x128xf32>
    %34 = tpu.matmul %33, %32, %cst_19 {dimension_numbers = #tpu.dot_dimension_numbers<[1], [0], [0], [1], [0, 0, 1, 1], [], []>} : vector<1x32xf32>, vector<32x128xf32>, vector<1x128xf32> -> vector<1x128xf32>
    %c0_20 = arith.constant 0 : index
    %c0_21 = arith.constant 0 : index
    %35 = vector.load %arg7[%c0_20, %c0_21] : memref<1x1xf32, #tpu.memory_space<vmem>>, vector<1x1xf32>
    %36 = vector.broadcast %35 : vector<1x1xf32> to vector<1x128xf32>
    %37 = arith.addf %34, %36 : vector<1x128xf32>
    %c0_22 = arith.constant 0 : index
    %c0_23 = arith.constant 0 : index
    %38 = vector.load %arg8[%c0_22, %c0_23] : memref<1x128xf32, #tpu.memory_space<vmem>>, vector<1x128xf32>
    tpu.vector_store %arg8[%c0_22, %c0_23], %37 {strides = array<i32>} : memref<1x128xf32, #tpu.memory_space<vmem>>, vector<1x128xf32>,
    return
  }
  func.func @transform_0(%arg0: i32) -> (i32, i32) {
    %c0_i32 = arith.constant 0 : i32
    %c0_i32_0 = arith.constant 0 : i32
    return %c0_i32, %arg0 : i32, i32
  }
  func.func @transform_1(%arg0: i32) -> (i32, i32) {
    %c0_i32 = arith.constant 0 : i32
    %c0_i32_0 = arith.constant 0 : i32
    %c0_i32_1 = arith.constant 0 : i32
    return %c0_i32, %c0_i32_0 : i32, i32
  }
  func.func @transform_2(%arg0: i32) -> (i32, i32) {
    %c0_i32 = arith.constant 0 : i32
    %c0_i32_0 = arith.constant 0 : i32
    %c0_i32_1 = arith.constant 0 : i32
    return %c0_i32, %c0_i32_0 : i32, i32
  }
  func.func @transform_3(%arg0: i32) -> (i32, i32, i32) {
    %c0_i32 = arith.constant 0 : i32
    %c0_i32_0 = arith.constant 0 : i32
    %c0_i32_1 = arith.constant 0 : i32
    %c0_i32_2 = arith.constant 0 : i32
    return %c0_i32, %c0_i32_0, %c0_i32_1 : i32, i32, i32
  }
  func.func @transform_4(%arg0: i32) -> (i32, i32, i32) {
    %c0_i32 = arith.constant 0 : i32
    %c0_i32_0 = arith.constant 0 : i32
    %c0_i32_1 = arith.constant 0 : i32
    %c0_i32_2 = arith.constant 0 : i32
    return %c0_i32, %c0_i32_0, %c0_i32_1 : i32, i32, i32
  }
  func.func @transform_5(%arg0: i32) -> (i32, i32) {
    %c0_i32 = arith.constant 0 : i32
    %c0_i32_0 = arith.constant 0 : i32
    %c0_i32_1 = arith.constant 0 : i32
    return %c0_i32, %c0_i32_0 : i32, i32
  }
  func.func @transform_6(%arg0: i32) -> (i32, i32) {
    %c0_i32 = arith.constant 0 : i32
    %c0_i32_0 = arith.constant 0 : i32
    %c0_i32_1 = arith.constant 0 : i32
    return %c0_i32, %c0_i32_0 : i32, i32
  }
  func.func @transform_7(%arg0: i32) -> (i32, i32) {
    %c0_i32 = arith.constant 0 : i32
    %c0_i32_0 = arith.constant 0 : i32
    return %c0_i32, %arg0 : i32, i32
  }
}

</mosaic_0001>

<bundles_post_ra>
// kernel: tpu_custom_call.1
= control target key start
LH: loop header
LB: loop body
LE: loop exit
PB: predicated region body
PF: predicated region fallthrough
CT: control target
= control target key end

     0   :  { %s799_s0 = inlined_call_operand.vmem [shape: f32[2,128], index: 0, kind: input, shape index: {}]   ;;  %s800_s1 = inlined_call_operand.vmem [shape: f32[32,2], index: 1, kind: input, shape index: {}]   ;;  %s801_s2 = inlined_call_operand.vmem [shape: f32[32,1], index: 2, kind: input, shape index: {}]   ;;  %s802_s3 = inlined_call_operand.vmem [shape: f32[2,32,32], index: 3, kind: input, shape index: {}]   ;;  %s803_s4 = inlined_call_operand.vmem [shape: f32[2,32,1], index: 4, kind: input, shape index: {}]   ;;  %s804_s5 = inlined_call_operand.vmem [shape: f32[1,32], index: 5, kind: input, shape index: {}]   ;;  %s805_s6 = inlined_call_operand.<no memory space> [shape: f32[1,1], index: 6, kind: input, shape index: {}]   ;;  %s806_s7 = inlined_call_operand.hbm [shape: f32[1,128], index: 7, kind: output, shape index: {}]  }
   0x1   :  { %v12_v0 = vstv %s805_s6 }
   0x2   :  { %13 = vst [vmem:[#allocation2] sm:$0x1] %v12_v0 }
   0x3   :  { %v62_v1 = vld [vmem:[%s801_s2] sm:$0xff]  ;;  %v643_v3 = vmov 0   ;;  %v63_v4 = vld [vmem:[%s801_s2 + $0x8] sm:$0xff] }
   0x4   :  { %v30_v2 = vld [vmem:[%s800_s1] sm:$0xff]  ;;  %588 = vset.pattern.permute.xlu1 %v643_v3  ;;  %587 = vset.pattern.permute.xlu0 %v643_v3  ;;  %v31_v5 = vld [vmem:[%s800_s1 + $0x8] sm:$0xff] }
   0x5   :  { %68 = vperm.xlu1 %588, %v62_v1   ;;  %36 = vperm.xlu0 %587, %v30_v2  }
   0x6   :  { %14 = vsyncpa [#allocation4], 0  ;;  %v33_v6 = vld [vmem:[%s800_s1 + $0x18] sm:$0xff]  ;;  %v644_v7 = vmov 1   ;;  %v32_v8 = vld [vmem:[%s800_s1 + $0x10] sm:$0xff]  ;;  %vm150_vm0 = vcmask 261120   ;;  %v54_v21 = vlaneseq }
   0x7   :  { %v64_v9 = vld [vmem:[%s801_s2 + $0x10] sm:$0xff]  ;;  %v65_v10 = vld [vmem:[%s801_s2 + $0x18] sm:$0xff]  ;;  %v122_v11 = vld [vmem:[%s802_s3] sm:$0xff]  ;;  %vm646_vm1 = vmmov 0   ;;  %s648_s23 = smov [#allocation3]  }
   0x8   :  { %528 = vmatprep.mubr.msk.f32.mxu0 %vm150_vm0, %v122_v11  ;;  %v126_v12 = vld [vmem:[%s803_s4] sm:$0xff]  ;;  %v127_v13 = vld [vmem:[%s803_s4 + $0x8] sm:$0xff]  ;;  %v128_v14 = vld [vmem:[%s803_s4 + $0x10] sm:$0xff]  ;;  %v744_v22 = vshrl.u32 %v54_v21, 7  ;;  %s474_s24 = sshll.u32 %s648_s23, 4  ;;  %s475_s24 = int_to_ptr.vmem [resolvable:$true] %s474_s24 }
   0x9   :  { %73 = vperm.xlu1 %588, %v63_v4   ;;  %41 = vperm.xlu0 %587, %v31_v5   ;;  %v490_v15 = vld [vmem:[%s803_s4 + $0x20] sm:$0xff]  ;;  %v129_v16 = vld [vmem:[%s803_s4 + $0x18] sm:$0xff]  ;;  %v492_v17 = vld [vmem:[%s803_s4 + $0x30] sm:$0xff]  ;;  %s619_s25 = scalar_lea.vmem %s475_s24, 16  ;;  %s623_s26 = scalar_lea.vmem %s475_s24, 32 }
   0xa   :  { %v491_v18 = vld [vmem:[%s803_s4 + $0x28] sm:$0xff]  ;;  %v384_v19 = vld [vmem:[#allocation2] sm:$0x1]  ;;  %v493_v20 = vld [vmem:[%s803_s4 + $0x38] sm:$0xff]  ;;  %v56_v25 = vsub.s32 0, %v744_v22  ;;  %v108_v27 = vsub.s32 1, %v744_v22  ;;  %p620_p0 = scmp.ne.s32.totalorder %s475_s24, %s619_s25  ;;  %p624_p1 = scmp.lt.s32.totalorder %s475_s24, %s475_s24 }
   0xb   :  { %v29_v26 = vld [vmem:[%s799_s0] sm:$0x3]  ;;  %v123_v62 = vld [vmem:[%s802_s3 + $0x8] sm:$0xff]  ;;  %v124_v63 = vld [vmem:[%s802_s3 + $0x10] sm:$0xff]  ;;  %p625_p2 = scmp.lt.s32.totalorder %s623_s26, %s619_s25 }
   0xc   :  { %v57_v30 = vrot.slane %v29_v26, %v56_v25  ;;  %v109_v31 = vrot.slane %v29_v26, %v108_v27  ;;  %v125_v0 = vld [vmem:[%s802_s3 + $0x18] sm:$0xff]  ;;  %v486_v1 = vld [vmem:[%s802_s3 + $0x20] sm:$0xff]  ;;  %v488_v21 = vld [vmem:[%s802_s3 + $0x30] sm:$0xff]  ;;  %v647_v26 = vmov 0.0  }
   0xd   :  { %589 = vset.pattern.permute.xlu1 %v644_v7  ;;  %51 = vperm.xlu0 %587, %v33_v6   ;;  %p626_p3 = por %p625_p2, %p624_p1 }
   0xe   :  { %95 = vperm.xlu1 %589, %v31_v5   ;;  %542 = vmatprep.mubr.msk.f32.mxu1 %vm150_vm0, %v486_v1 }
   0xf   :  { %p627_p4 = pnand %p626_p3, %p620_p0 }
  0x11   :  { %591 = vset.pattern.permute.xlu0 %v644_v7 }
  0x12   :  { %590 = vset.pattern.permute.xlu1 %v643_v3  ;;  %91 = vperm.xlu0 %591, %v30_v2  }
  0x13   :  { %46 = vperm.xlu1 %590, %v32_v8  }
  0x16   :  { %99 = vperm.xlu0 %591, %v32_v8  }
  0x17   :  { %78 = vperm.xlu1 %590, %v64_v9  }
  0x1a   :  { %594 = vset.pattern.permute.xlu0 %v643_v3 }
  0x1b   :  { %83 = vperm.xlu1 %590, %v65_v10   ;;  %137 = vperm.xlu0 %594, %v127_v13  }
  0x1f   :  { %592 = vset.pattern.permute.xlu1 %v644_v7  ;;  %264 = vperm.xlu0 %594, %v490_v15  }
  0x20   :  { %103 = vperm.xlu1 %592, %v33_v6  }
  0x23   :  { %274 = vperm.xlu0 %594, %v492_v17  }
  0x24   :  { %593 = vset.pattern.permute.xlu1 %v643_v3 }
  0x25   :  { %132 = vperm.xlu1 %593, %v126_v12  }
  0x27   :  { %387 = vperm.xlu0 %594, %v384_v19  }
  0x29   :  { %142 = vperm.xlu1 %593, %v128_v14  }
  0x2d   :  { %147 = vperm.xlu1 %593, %v129_v16  }
  0x31   :  { %269 = vperm.xlu1 %593, %v491_v18  }
  0x35   :  { %279 = vperm.xlu1 %593, %v493_v20   ;;  %v487_v20 = vld [vmem:[%s802_s3 + $0x28] sm:$0xff] }
  0x84   :  { %v69_v23 = vpop.permute.xlu1 %68  ;;  %v37_v24 = vpop.permute.xlu0 %36 }
  0x85   :  { %v58_v35 = vmul.f32 %v57_v30, %v37_v24  ;;  %v645_v24 = vmov 0.0|0.0  }
  0x87   :  { %v86_v40 = vadd.f32 %v69_v23, %v58_v35  ;;  %v489_v23 = vld [vmem:[%s802_s3 + $0x38] sm:$0xff] }
  0x88   :  { %v74_v28 = vpop.permute.xlu1 %73  ;;  %v42_v29 = vpop.permute.xlu0 %41 }
  0x89   :  { %v59_v32 = vmul.f32 %v57_v30, %v42_v29 }
  0x8b   :  { %v87_v37 = vadd.f32 %v74_v28, %v59_v32 }
  0x8c   :  { %v52_v33 = vpop.permute.xlu0 %51 }
  0x8d   :  { %v96_v34 = vpop.permute.xlu1 %95  ;;  %v61_v50 = vmul.f32 %v57_v30, %v52_v33 }
  0x8e   :  { %v111_v36 = vmul.f32 %v109_v31, %v96_v34 }
  0x90   :  { %v115_v38 = vadd.f32 %v111_v36, %v87_v37 }
  0x91   :  { %v92_v39 = vpop.permute.xlu0 %91 }
  0x92   :  { %v110_v41 = vmul.f32 %v109_v31, %v92_v39  ;;  %v47_v42 = vpop.permute.xlu1 %46  ;;  %595 = vtanh.f32 %v115_v38 }
  0x93   :  { %v60_v46 = vmul.f32 %v57_v30, %v47_v42 }
  0x94   :  { %v114_v43 = vadd.f32 %v110_v41, %v86_v40 }
  0x95   :  { %v100_v45 = vpop.permute.xlu0 %99 }
  0x96   :  { %597 = vtanh.f32 %v114_v43  ;;  %v79_v44 = vpop.permute.xlu1 %78  ;;  %v112_v49 = vmul.f32 %v109_v31, %v100_v45  ;;  %v383_v45 = vld [vmem:[%s804_s5] sm:$0x1] }
  0x97   :  { %v88_v48 = vadd.f32 %v79_v44, %v60_v46 }
  0x99   :  { %v116_v52 = vadd.f32 %v112_v49, %v88_v48 }
  0x9a   :  { %v84_v47 = vpop.permute.xlu1 %83  ;;  %v138_v4 = vpop.permute.xlu0 %137 }
  0x9b   :  { %v89_v55 = vadd.f32 %v84_v47, %v61_v50  ;;  %599 = vtanh.f32 %v116_v52 }
  0x9c   :  { %v596_v51 = vpop.eup %595 }
  0x9e   :  { %v265_v28 = vpop.permute.xlu0 %264 }
  0x9f   :  { %v104_v53 = vpop.permute.xlu1 %103 }
  0xa0   :  { %v598_v54 = vpop.eup %597  ;;  %v113_v56 = vmul.f32 %v109_v31, %v104_v53 }
  0xa1   :  { %v559_v57 = vpack.c.bf16 %v596_v51, %v598_v54 }
  0xa2   :  { %v117_v58 = vadd.f32 %v113_v56, %v89_v55  ;;  %v275_v35 = vpop.permute.xlu0 %274 }
  0xa3   :  { %560 = vmatprep.subr.bf16.mxu0 %v559_v57 }
  0xa4   :  { %601 = vtanh.f32 %v117_v58  ;;  %562 = vmatpush3.bf16.msra.mxu0 %v559_v57  ;;  %v133_v2 = vpop.permute.xlu1 %132 }
  0xa5   :  { %v600_v59 = vpop.eup %599 }
  0xa6   :  { %v388_v46 = vpop.permute.xlu0 %387 }
  0xa7   :  { %v393_v47 = vrot.slane %v388_v46, %v56_v25 }
  0xa8   :  { %v143_v3 = vpop.permute.xlu1 %142 }
  0xac   :  { %v148_v9 = vpop.permute.xlu1 %147 }
  0xae   :  { %v602_v60 = vpop.eup %601 }
  0xaf   :  { %v563_v61 = vpack.c.bf16 %v602_v60, %v600_v59 }
  0xb0   :  { %v270_v27 = vpop.permute.xlu1 %269 }
  0xb1   :  { %564 = vmatprep.subr.bf16.mxu0 %v563_v61 }
  0xb2   :  { %566 = vmatpush3.bf16.msra.mxu0 %v563_v61 }
  0xb3   :  { %575 = vmatprep.subr.bf16.mxu0 %v645_v24 }
  0xb4   :  { %v280_v33 = vpop.permute.xlu1 %279 }
  0xb5   :  { %529 = vmatmul.mubr.msk.f32.vlgmr.msra.gmra.mrb[0].mxu0 %vm150_vm0, %v123_v62 }
  0xb6   :  { %531 = vmatprep.mubr.msk.f32.mxu0 %vm150_vm0, %v124_v63 }
  0xb9   :  { %532 = vmatmul.mubr.msk.f32.gmra.mrb[2].mxu0 %vm150_vm0, %v125_v0 }
  0xba   :  { %556 = vmatprep.mubr.msk.f32.mxu0 %vm646_vm1, %v647_v26 }
 0x188   :  { %v530_v5 = vpop.f32.mrb[0].mxu0 }
 0x189   :  { %v235_v6 = vadd.f32 %v530_v5, %v138_v4  ;;  %v229_v7 = vpop.f32.mrb[1].mxu0 }
 0x18a   :  { %v230_v8 = vadd.f32 %v229_v7, %v133_v2 }
 0x18b   :  { %603 = vtanh.f32 %v235_v6 }
 0x18c   :  { %605 = vtanh.f32 %v230_v8  ;;  %v533_v10 = vpop.f32.mrb[2].mxu0 }
 0x18d   :  { %v245_v11 = vadd.f32 %v533_v10, %v148_v9  ;;  %v239_v12 = vpop.f32.mrb[3].mxu0 }
 0x18e   :  { %v240_v13 = vadd.f32 %v239_v12, %v143_v3 }
 0x18f   :  { %607 = vtanh.f32 %v245_v11 }
 0x190   :  { %609 = vtanh.f32 %v240_v13 }
 0x195   :  { %v604_v14 = vpop.eup %603 }
 0x196   :  { %v606_v15 = vpop.eup %605 }
 0x197   :  { %v567_v16 = vpack.c.bf16 %v604_v14, %v606_v15 }
 0x199   :  { %v608_v17 = vpop.eup %607  ;;  %568 = vmatprep.subr.bf16.mxu1 %v567_v16 }
 0x19a   :  { %v610_v18 = vpop.eup %609  ;;  %570 = vmatpush3.bf16.msra.mxu1 %v567_v16 }
 0x19b   :  { %v571_v19 = vpack.c.bf16 %v608_v17, %v610_v18 }
 0x19d   :  { %572 = vmatprep.subr.bf16.mxu1 %v571_v19 }
 0x19e   :  { %574 = vmatpush3.bf16.msra.mxu1 %v571_v19 }
 0x1a1   :  { %543 = vmatmul.mubr.msk.f32.vlgmr.msra.gmra.mrb[0].mxu1 %vm150_vm0, %v487_v20 }
 0x1a2   :  { %545 = vmatprep.mubr.msk.f32.mxu1 %vm150_vm0, %v488_v21 }
 0x1a5   :  { %546 = vmatmul.mubr.msk.f32.gmra.mrb[2].mxu1 %vm150_vm0, %v489_v23 }
 0x274   :  { %v544_v29 = vpop.f32.mrb[0].mxu1 }
 0x275   :  { %v366_v30 = vadd.f32 %v544_v29, %v270_v27  ;;  %v360_v31 = vpop.f32.mrb[1].mxu1 }
 0x276   :  { %v361_v32 = vadd.f32 %v360_v31, %v265_v28 }
 0x277   :  { %611 = vtanh.f32 %v366_v30 }
 0x278   :  { %613 = vtanh.f32 %v361_v32  ;;  %v547_v34 = vpop.f32.mrb[2].mxu1 }
 0x279   :  { %v376_v36 = vadd.f32 %v547_v34, %v280_v33  ;;  %v370_v37 = vpop.f32.mrb[3].mxu1 }
 0x27a   :  { %v371_v38 = vadd.f32 %v370_v37, %v275_v35 }
 0x27b   :  { %615 = vtanh.f32 %v376_v36 }
 0x27c   :  { %617 = vtanh.f32 %v371_v38 }
 0x281   :  { %v612_v39 = vpop.eup %611 }
 0x282   :  { %v614_v40 = vpop.eup %613 }
 0x283   :  { %v576_v41 = vpack.c.bf16 %v612_v39, %v614_v40 }
 0x285   :  { %v616_v42 = vpop.eup %615  ;;  %577 = vmatpush3.bf16.msra.mxu0 %v576_v41 }
 0x286   :  { %v618_v43 = vpop.eup %617  ;;  %578 = vmatprep.subr.bf16.mxu0 %v645_v24 }
 0x287   :  { %v579_v44 = vpack.c.bf16 %v616_v42, %v618_v43 }
 0x289   :  { %580 = vmatpush3.bf16.msra.mxu0 %v579_v44 }
 0x28c   :  { %557 = vmatmul.mubr.msk.f32.vlgmr.msra.gmra.mrb[4].mxu0 %vm150_vm0, %v383_v45 }
 0x35f   :  { %v463_v48 = vpop.f32.mrb[4].mxu0 }
 0x360   :  { %v464_v49 = vadd.f32 %v463_v48, %v393_v47  ;;  %v558_v50 = vpop.f32.mrb[5].mxu0 }
 0x362   :  { %467 = vst [vmem:[#allocation3] sm:$0x1] %v464_v49 }
 0x363   :  { %630 = shalt.err (!%p627_p4)
}
 0x364   :  { %s631_s28 = scalar_lea.hbm %s806_s7, 16 }
 0x365   :  { %p632_p5 = scmp.ne.s32.totalorder %s806_s7, %s631_s28  ;;  %p635_p6 = scmp.lt.u32.totalorder %s631_s28, %s806_s7 }
 0x367   :  { %p637_p7 = pnand %p635_p6, %p632_p5 }
 0x369   :  { %640 = shalt.err (!%p637_p7)
}
 0x36a   :  { %477 = dma.vmem_to_hbm [thread:$0]  %s475_s24, 16, %s806_s7, [#allocation4]  }
 0x36b   :  { %641 = dma.done.wait [#allocation4], 16  }
 0x36c   :  { %642 = vsyncadd [#allocation4], 4294967280 }
 0x36d   :  { %481 = vsyncpa [#allocation4], 1 }

</bundles_post_ra>
